<compile_context>
chip_gen: v5e
topology: v5e:2x2
jax: 0.10.0
libtpu: 0.0.40
codegen_flags: <defaults>
</compile_context>

<pallas_src>
import functools

import jax
import jax.numpy as jnp
from jax.experimental import pallas as pl
from jax.experimental.pallas import tpu as pltpu


def _focal_partial_kernel(x_ref, t_ref, o_ref, *, n_rows):
    """Per-row-tile partial sum of cross-entropy NLL.

    x_ref: (TN, C) logits tile, t_ref: (TN, 1) int32 targets tile,
    o_ref: (1, 8, 128) f32 output block (filled lane-dense with the tile's sum).
    """
    i = pl.program_id(0)
    x = x_ref[...].astype(jnp.float32)          # (TN, C)
    t = t_ref[...]                               # (TN, 1) int32
    tn, c = x.shape

    # one-hot pick of the target logit via a lane iota
    col = jax.lax.broadcasted_iota(jnp.int32, (tn, c), 1)
    one_hot = (col == t).astype(jnp.float32)     # (TN, C)

    # numerically stable logsumexp along the class (lane) axis
    row_max = jnp.max(x, axis=1, keepdims=True)                           # (TN, 1)
    lse = jnp.log(jnp.sum(jnp.exp(x - row_max), axis=1, keepdims=True)) + row_max
    picked = jnp.sum(x * one_hot, axis=1, keepdims=True)                  # x[i, t_i]
    nll = lse - picked                                                    # (TN, 1)

    # mask rows past the true batch size (ragged / padded last tile)
    row_ids = i * tn + jax.lax.broadcasted_iota(jnp.int32, (tn, 1), 0)
    nll = jnp.where(row_ids < n_rows, nll, 0.0)

    tile_sum = jnp.sum(nll)                                               # scalar
    # lane-dense (unmasked) store of the partial sum for this tile
    o_ref[...] = jnp.full(o_ref.shape, tile_sum, dtype=jnp.float32)


def focal_loss_1(logits, targets, *, gamma=0.0, eps=1e-7, block_rows=None):
    """FocalLoss_1.forward. logits: (N, C) float, targets: (N,) int."""
    del eps  # declared in __init__ but unused in the PyTorch forward
    n, c = logits.shape

    if block_rows is None:
        # aim for ~2 MiB logits tiles; with 2x double-buffering this is ~4 MiB
        # of VMEM, comfortably under the scoped default on v5e/v6e/v7x.
        bytes_per_row = c * jnp.dtype(logits.dtype).itemsize
        block_rows = max(8, (2 << 20) // max(bytes_per_row, 1))

    if block_rows >= n or n < 8:
        tn = n                                    # full-dim row block is always legal
    else:
        tn = max(8, (block_rows // 8) * 8)        # sublane-aligned row tile
    num_tiles = -(-n // tn)

    t2d = targets.reshape(n, 1).astype(jnp.int32)
    kernel = functools.partial(_focal_partial_kernel, n_rows=n)

    partials = pl.pallas_call(
        kernel,
        out_shape=jax.ShapeDtypeStruct((num_tiles, 8, 128), jnp.float32),
        grid=(num_tiles,),
        in_specs=[
            pl.BlockSpec((tn, c), lambda i: (i, 0)),    # streamed logits row-tile
            pl.BlockSpec((tn, 1), lambda i: (i, 0)),    # matching targets row-tile
        ],
        out_specs=pl.BlockSpec((1, 8, 128), lambda i: (i, 0, 0)),
        compiler_params=pltpu.CompilerParams(
            dimension_semantics=("parallel",)),         # no carried state -> megacore OK
    )(logits, t2d)

    # tiny epilogue in plain JAX: mean over rows + focal modulation
    logp = jnp.sum(partials[:, 0, 0]) / n
    if gamma == 0.0:            # trace-time specialization: loss == logp
        return logp
    p = jnp.exp(-logp)
    return (1.0 - p) ** gamma * logp


def _reference_focal_loss_1(logits, targets, gamma=0.0):
    # pure-JAX reference for sanity checking
    lse = jax.scipy.special.logsumexp(logits.astype(jnp.float32), axis=1)
    picked = jnp.take_along_axis(logits, targets[:, None], axis=1)[:, 0].astype(jnp.float32)
    logp = jnp.mean(lse - picked)
    p = jnp.exp(-logp)
    return jnp.power(1.0 - p, gamma) * logp


if __name__ == "__main__":
    key = jax.random.PRNGKey(0)
    k1, k2, k3, k4 = jax.random.split(key, 4)

    # case 1: small batch, gamma=0 (module default), single tile
    N1, C1 = 8, 16
    logits1 = jax.random.normal(k1, (N1, C1), dtype=jnp.float32)
    targets1 = jax.random.randint(k2, (N1,), 0, C1, dtype=jnp.int32)
    loss1 = focal_loss_1(logits1, targets1, gamma=0.0)
    jax.block_until_ready(loss1)
    ref1 = _reference_focal_loss_1(logits1, targets1, gamma=0.0)
    assert jnp.allclose(loss1, ref1, atol=1e-5, rtol=1e-4), (loss1, ref1)

    # case 2: forced row tiling with a ragged last tile (N % TN != 0) and a
    # nonzero gamma -> exercises masking, multi-tile partials and the focal epilogue
    N2, C2 = 50, 128
    logits2 = jax.random.normal(k3, (N2, C2), dtype=jnp.float32)
    targets2 = jax.random.randint(k4, (N2,), 0, C2, dtype=jnp.int32)
    loss2 = focal_loss_1(logits2, targets2, gamma=2.0, block_rows=16)
    jax.block_until_ready(loss2)
    ref2 = _reference_focal_loss_1(logits2, targets2, gamma=2.0)
    assert jnp.allclose(loss2, ref2, atol=1e-5, rtol=1e-4), (loss2, ref2)

    print("KERNEL_OK")
</pallas_src>

<mosaic_0001>
module attributes {stable_mosaic.version = 11 : i64} {
  func.func @_focal_partial_kernel(%arg0: i32, %arg1: memref<8x16xf32, #tpu.memory_space<vmem>>, %arg2: memref<8x1xi32, #tpu.memory_space<vmem>>, %arg3: memref<1x8x128xf32, #tpu.memory_space<vmem>>) attributes {dimension_semantics = [#tpu.dimension_semantics<parallel>], iteration_bounds = array<i64: 1>, scalar_prefetch = 0 : i64, scratch_operands = 0 : i64, tpu.core_type = #tpu.core_type<tc>, window_params = [{transform_indices = @transform_0, window_bounds = array<i64: 8, 16>}, {transform_indices = @transform_1, window_bounds = array<i64: 8, 1>}, {transform_indices = @transform_2, window_bounds = array<i64: 1, 8, 128>}]} {
    %c0 = arith.constant 0 : index
    %c0_0 = arith.constant 0 : index
    %0 = vector.load %arg1[%c0, %c0_0] : memref<8x16xf32, #tpu.memory_space<vmem>>, vector<8x16xf32>
    %c0_1 = arith.constant 0 : index
    %c0_2 = arith.constant 0 : index
    %1 = vector.load %arg2[%c0_1, %c0_2] : memref<8x1xi32, #tpu.memory_space<vmem>>, vector<8x1xi32>
    %2 = tpu.iota {dimensions = array<i32: 1>} : vector<8x16xi32>
    %3 = vector.broadcast %1 : vector<8x1xi32> to vector<8x16xi32>
    %4 = arith.cmpi eq, %2, %3 : vector<8x16xi32>
    %5 = arith.extui %4 : vector<8x16xi1> to vector<8x16xi32>
    %6 = arith.sitofp %5 : vector<8x16xi32> to vector<8x16xf32>
    %cst = arith.constant dense<0xFF800000> : vector<8xf32>
    %7 = vector.multi_reduction <maximumf>, %0, %cst [1] : vector<8x16xf32> to vector<8xf32>
    %8 = vector.shape_cast %7 : vector<8xf32> to vector<8x1xf32>
    %9 = vector.broadcast %8 : vector<8x1xf32> to vector<8x16xf32>
    %10 = arith.subf %0, %9 : vector<8x16xf32>
    %11 = math.exp %10 : vector<8x16xf32>
    %cst_3 = arith.constant dense<0.000000e+00> : vector<8xf32>
    %12 = vector.multi_reduction <add>, %11, %cst_3 [1] : vector<8x16xf32> to vector<8xf32>
    %13 = vector.shape_cast %12 : vector<8xf32> to vector<8x1xf32>
    %14 = math.log %13 : vector<8x1xf32>
    %15 = arith.addf %14, %8 : vector<8x1xf32>
    %16 = arith.mulf %0, %6 : vector<8x16xf32>
    %cst_4 = arith.constant dense<0.000000e+00> : vector<8xf32>
    %17 = vector.multi_reduction <add>, %16, %cst_4 [1] : vector<8x16xf32> to vector<8xf32>
    %18 = vector.shape_cast %17 : vector<8xf32> to vector<8x1xf32>
    %19 = arith.subf %15, %18 : vector<8x1xf32>
    %c8_i32 = arith.constant 8 : i32
    %20 = arith.muli %arg0, %c8_i32 : i32
    %21 = tpu.iota {dimensions = array<i32: 0>} : vector<8x1xi32>
    %22 = vector.broadcast %20 : i32 to vector<8x1xi32>
    %23 = arith.addi %22, %21 : vector<8x1xi32>
    %c8_i32_5 = arith.constant 8 : i32
    %24 = vector.broadcast %c8_i32_5 : i32 to vector<8x1xi32>
    %25 = arith.cmpi slt, %23, %24 : vector<8x1xi32>
    %cst_6 = arith.constant 0.000000e+00 : f32
    %26 = vector.broadcast %cst_6 : f32 to vector<8x1xf32>
    %27 = arith.select %25, %19, %26 : vector<8x1xi1>, vector<8x1xf32>
    %28 = vector.shape_cast %27 : vector<8x1xf32> to vector<1x8x1xf32>
    %cst_7 = arith.constant dense<0.000000e+00> : vector<1xf32>
    %29 = vector.multi_reduction <add>, %28, %cst_7 [1, 2] : vector<1x8x1xf32> to vector<1xf32>
    %30 = vector.shape_cast %29 : vector<1xf32> to vector<1x1x1xf32>
    %31 = vector.extract %30[0, 0, 0] : f32 from vector<1x1x1xf32>
    %32 = vector.broadcast %31 : f32 to vector<1x8x128xf32>
    %c0_8 = arith.constant 0 : index
    %c0_9 = arith.constant 0 : index
    %c0_10 = arith.constant 0 : index
    %33 = vector.load %arg3[%c0_8, %c0_9, %c0_10] : memref<1x8x128xf32, #tpu.memory_space<vmem>>, vector<1x8x128xf32>
    tpu.vector_store %arg3[%c0_8, %c0_9, %c0_10], %32 {strides = array<i32>} : memref<1x8x128xf32, #tpu.memory_space<vmem>>, vector<1x8x128xf32>,
    return
  }
  func.func @transform_0(%arg0: i32) -> (i32, i32) {
    %c0_i32 = arith.constant 0 : i32
    %c0_i32_0 = arith.constant 0 : i32
    return %arg0, %c0_i32 : i32, i32
  }
  func.func @transform_1(%arg0: i32) -> (i32, i32) {
    %c0_i32 = arith.constant 0 : i32
    %c0_i32_0 = arith.constant 0 : i32
    return %arg0, %c0_i32 : i32, i32
  }
  func.func @transform_2(%arg0: i32) -> (i32, i32, i32) {
    %c0_i32 = arith.constant 0 : i32
    %c0_i32_0 = arith.constant 0 : i32
    %c0_i32_1 = arith.constant 0 : i32
    return %arg0, %c0_i32, %c0_i32_0 : i32, i32, i32
  }
}

</mosaic_0001>

<bundles_post_ra>
// kernel: tpu_custom_call.1
= control target key start
LH: loop header
LB: loop body
LE: loop exit
PB: predicated region body
PF: predicated region fallthrough
CT: control target
= control target key end

     0   :  { %vm22_vm0 = vcmask 130048   ;;  %s143_s0 = inlined_call_operand.vmem [shape: f32[8,16], index: 0, kind: input, shape index: {}]   ;;  %s144_s1 = inlined_call_operand.vmem [shape: s32[8,1], index: 1, kind: input, shape index: {}]   ;;  %s145_s2 = inlined_call_operand.hbm [shape: f32[1,8,128], index: 2, kind: output, shape index: {}]  }
   0x1   :  { %v12_v0 = vld [vmem:[%s143_s0] sm:$0xff] }
   0x2   :  { %7 = vsyncpa [#allocation3], 0  ;;  %v23_v1 = vsel %vm22_vm0, %v12_v0, -inf  ;;  %v113_v2 = vmov 0   ;;  %v13_v3 = vld [vmem:[%s144_s1] sm:$0xff]  ;;  %v14_v9 = vlaneseq  ;;  %v114_v12 = vmov 0.0  }
   0x3   :  { %82 = vset.pattern.permute.xlu0 %v113_v2  ;;  %vm47_vm2 = vcmask 7168   ;;  %s115_s0 = smov [#allocation2]   ;;  %s67_s15 = sshll.u32 %s145_s2, 4  ;;  %s68_s15 = int_to_ptr.hbm [resolvable:$true] %s67_s15 }
   0x4   :  { %24 = vmax.xlane.f32.xlu0 %v23_v1  ;;  %v15_v10 = vand.u32 127, %v14_v9  ;;  %s65_s1 = sshll.u32 %s115_s0, 4  ;;  %s66_s1 = int_to_ptr.vmem [resolvable:$true] %s65_s1 }
  0x18   :  { %17 = vperm.xlu0 %82, %v13_v3  }
  0x77   :  { %v25_v4 = vpop.xlane.xlu0 %24 }
  0x78   :  { %v26_v5 = vsub.f32 %v12_v0, %v25_v4 }
  0x7a   :  { %v27_v6 = vmul.f32 1.442695, %v26_v5 }
  0x7c   :  { %83 = vpow2.f32 %v27_v6 }
  0x82   :  { %v84_v7 = vpop.eup %83 }
  0x83   :  { %v29_v8 = vsel %vm22_vm0, %v84_v7, 0.0 }
  0x84   :  { %30 = vadd.xlane.f32.xlu1 %v29_v8 }
  0x8a   :  { %v18_v11 = vpop.permute.xlu0 %17 }
  0x8b   :  { %vm19_vm1 = vcmp.eq.s32.totalorder %v15_v10, %v18_v11 }
  0x8c   :  { %v76_v13 = vsel %vm19_vm1, 1.0, %v114_v12 }
  0x8d   :  { %v35_v14 = vmul.f32 %v76_v13, %v12_v0 }
  0x8f   :  { %v36_v15 = vsel %vm22_vm0, %v35_v14, 0.0 }
  0x90   :  { %37 = vadd.xlane.f32.xlu1 %v36_v15 }
  0xf7   :  { %v31_v16 = vpop.xlane.xlu1 %30 }
  0xf8   :  { %85 = vlog2.f32 %v31_v16 }
  0xfe   :  { %v86_v17 = vpop.eup %85 }
  0xff   :  { %v33_v18 = vmul.f32 0.6931472, %v86_v17 }
 0x101   :  { %v34_v19 = vadd.f32 %v33_v18, %v25_v4 }
 0x103   :  { %v38_v20 = vpop.xlane.xlu1 %37 }
 0x104   :  { %v39_v21 = vsub.f32 %v34_v19, %v38_v20 }
 0x106   :  { %v48_v22 = vsel %vm47_vm2, %v39_v21, 0.0 }
 0x107   :  { %49 = vadd.xlane.f32.xlu2 %v48_v22 }
 0x17a   :  { %v50_v23 = vpop.xlane.xlu2 %49 }
 0x17b   :  { %v51_v24 = vrot.slane %v50_v23, 4 }
 0x17d   :  { %v52_v25 = vadd.f32 %v51_v24, %v50_v23 }
 0x17f   :  { %v53_v26 = vrot.slane %v52_v25, 2 }
 0x181   :  { %v54_v27 = vadd.f32 %v53_v26, %v52_v25 }
 0x183   :  { %v55_v28 = vrot.slane %v54_v27, 1 }
 0x185   :  { %v56_v29 = vadd.f32 %v55_v28, %v54_v27 }
 0x187   :  { %77 = vpush %v56_v29 }
 0x1b8   :  { %s78_s16 = spop %77 }
 0x1b9   :  { %v58_v30 = vstv %s78_s16 }
 0x1ba   :  { %59 = vst [vmem:[#allocation2] sm:$0xff] %v58_v30 }
 0x1bb   :  { %70 = dma.vmem_to_hbm [thread:$0]  %s66_s1, 128, %s68_s15, [#allocation3]  }
 0x1bc   :  { %111 = dma.done.wait [#allocation3], 128  }
 0x1bd   :  { %112 = vsyncadd [#allocation3], 4294967168 }
 0x1be   :  { %75 = vsyncpa [#allocation3], 1 }

</bundles_post_ra>
